<compile_context>
chip_gen: v5e
topology: v5e:2x2
jax: 0.10.0
libtpu: 0.0.40
codegen_flags: <defaults>
</compile_context>

<pallas_src>
import functools

import jax
import jax.numpy as jnp
from jax import lax
from jax.experimental import pallas as pl
from jax.experimental.pallas import tpu as pltpu


def _round_up(x, m):
    return ((x + m - 1) // m) * m


def _lwt_kernel(sm_ref, fu_ref, num_ref, valid_ref, sq_pc_ref, sq_nc_ref, *,
                alpha, margin, c_tile, window, unroll_threshold=8):
    """One (lane-tile, channel-tile) grid step.

    sm_ref    : (win, TM)     f32  unfolded soft-map columns (same block for every ci)
    fu_ref    : (CT, win, TM) bf16 unfolded feature columns for this channel tile
    num_ref   : (1, TM)       f32  per-column valid * sum_w(triple)  (written at ci==last)
    valid_ref : (1, TM)       f32  per-column validity mask          (written at ci==last)
    sq_*_ref  : (win, TM)     f32  VMEM scratch accumulators across channel tiles
    """
    eps = 1e-6
    ci = pl.program_id(1)
    last = pl.num_programs(1) - 1

    @pl.when(ci == 0)
    def _():
        sq_pc_ref[...] = jnp.zeros_like(sq_pc_ref)
        sq_nc_ref[...] = jnp.zeros_like(sq_nc_ref)

    sm = sm_ref[...]                                            # (win, TM)
    pos_cnt = jnp.sum(sm, axis=0, keepdims=True)                # (1, TM)
    neg_cnt = window - pos_cnt                                  # sum(1-sm) == W - sum(sm)
    # Hoisted reciprocals go to the (otherwise idle) EUP; the channel loop below
    # is then pure mul/add on the VPU.
    inv_pos = pl.reciprocal(pos_cnt + eps, approx=True)
    inv_neg = pl.reciprocal(neg_cnt + eps, approx=True)

    def channel_step(ch, carry):
        sq_pc, sq_nc = carry
        f = fu_ref[ch].astype(jnp.float32)                      # (win, TM)
        s_smf = jnp.sum(sm * f, axis=0, keepdims=True)          # (1, TM)
        s_f = jnp.sum(f, axis=0, keepdims=True)
        pc = s_smf * inv_pos
        nc = (s_f - s_smf) * inv_neg                            # sum((1-sm)*f) identity
        return sq_pc + (pc - f) ** 2, sq_nc + (nc - f) ** 2

    carry = (sq_pc_ref[...], sq_nc_ref[...])
    if c_tile <= unroll_threshold:
        # Small tile: static unroll keeps LLO scheduling visibility.
        for ch in range(c_tile):
            carry = channel_step(ch, carry)
    else:
        # Larger tile: bound live ranges / vreg pressure with a real loop.
        carry = lax.fori_loop(0, c_tile, channel_step, carry, unroll=2)
    sq_pc_ref[...] = carry[0]
    sq_nc_ref[...] = carry[1]

    @pl.when(ci == last)
    def _():
        # Hard map == thresholded soft map (threshold commutes with unfold);
        # is_pos is recomputed here so the mask is not live across the channel loop.
        is_pos = sm > 0.5
        pos_hard = jnp.sum(is_pos.astype(jnp.float32), axis=0, keepdims=True)
        valid = jnp.logical_and(pos_hard > 0.5, (window - pos_hard) > 0.5)
        valid = valid.astype(jnp.float32)                       # (1, TM)
        # (1-exp(-a*sq_pc)) - (1-exp(-a*sq_nc)) == exp(-a*sq_nc) - exp(-a*sq_pc)
        d = jnp.exp(-alpha * carry[1]) - jnp.exp(-alpha * carry[0])   # (win, TM)
        triple = jnp.maximum(jnp.where(is_pos, d, -d) + margin, 0.0)
        num_ref[...] = valid * jnp.sum(triple, axis=0, keepdims=True)  # lane-dense
        valid_ref[...] = valid


def _bilinear_resize_nchw(x, out_h, out_w):
    """Matches torch F.interpolate(mode='bilinear', align_corners=False)."""
    _, _, h, w = x.shape
    sy = h / out_h
    sx = w / out_w
    ys = jnp.clip((jnp.arange(out_h, dtype=jnp.float32) + 0.5) * sy - 0.5, 0.0, h - 1)
    xs = jnp.clip((jnp.arange(out_w, dtype=jnp.float32) + 0.5) * sx - 0.5, 0.0, w - 1)
    y0 = jnp.floor(ys).astype(jnp.int32)
    y1 = jnp.minimum(y0 + 1, h - 1)
    x0 = jnp.floor(xs).astype(jnp.int32)
    x1 = jnp.minimum(x0 + 1, w - 1)
    wy = (ys - y0.astype(jnp.float32))[:, None]                 # (out_h, 1)
    wx = (xs - x0.astype(jnp.float32))[None, :]                 # (1, out_w)

    def gather(yi, xi):
        return x[:, :, yi, :][:, :, :, xi]                      # (b, c, oh, ow)

    top = gather(y0, x0) * (1.0 - wx) + gather(y0, x1) * wx
    bot = gather(y1, x0) * (1.0 - wx) + gather(y1, x1) * wx
    return top * (1.0 - wy) + bot * wy


def _unfold_cols(x, k, s):
    """nn.Unfold(kernel_size=k, stride=s) with PyTorch window ordering, laid out
    directly as (c, k*k, b, h', w') so batch and spatial flatten into lanes."""
    b, c, h, w = x.shape
    hp = (h - k) // s + 1
    wp = (w - k) // s + 1
    if s == k:
        # Non-overlapping windows: a single reshape+transpose (no k^2 slice/stack).
        xc = x[:, :, :hp * k, :wp * k]
        xr = xc.reshape(b, c, hp, k, wp, k)
        return jnp.transpose(xr, (1, 3, 5, 0, 2, 4)).reshape(c, k * k, b, hp, wp)
    patches = []
    for ki in range(k):
        for kj in range(k):
            patches.append(
                x[:, :, ki:ki + s * (hp - 1) + 1:s, kj:kj + s * (wp - 1) + 1:s]
            )                                                    # (b, c, hp, wp)
    stk = jnp.stack(patches, axis=0)                             # (win, b, c, hp, wp)
    return jnp.transpose(stk, (2, 0, 1, 3, 4))                   # (c, win, b, hp, wp)


def local_window_triple_loss(saliency_map, feat, *, kernel, stride, alpha,
                             margin=0.5, feat_dtype=jnp.bfloat16, fu_buffers=None):
    """JAX/Pallas equivalent of LocalWindowTripleLoss.forward(map, feat, margin)."""
    b, c, hf, wf = feat.shape
    softmap = _bilinear_resize_nchw(saliency_map.astype(jnp.float32), hf, wf)

    win = kernel * kernel
    # TODO(synk): for stride < kernel, gather windows in-kernel from an HBM feat
    # ref instead of materializing the k^2-replicated unfolded features here.
    u_soft = _unfold_cols(softmap, kernel, stride)[0]            # (win, b, hp, wp) f32
    # Cast features BEFORE the unfold/transpose so the XLA-side glue moves bf16
    # bytes; accumulate in f32 inside the kernel.
    # TODO(synk): on v5e (no native bf16 VPU) benchmark feat_dtype=float32 for
    # VPU-bound (large-c) shapes.
    u_feat = _unfold_cols(feat.astype(feat_dtype), kernel, stride)  # (c, win, b, hp, wp)
    hp, wp = u_soft.shape[-2:]
    L = hp * wp
    M = b * L                                                    # independent columns
    itemsize = jnp.dtype(feat_dtype).itemsize

    sm = u_soft.reshape(win, M).astype(jnp.float32)
    fu = u_feat.reshape(c, win, M)

    # --- Lane tiling: ALWAYS a multiple of 128 (full-lane vregs + unmasked stores);
    # sized so the full-c feature block is ~2 MiB, clamped to [512, 4096] lanes.
    m128 = _round_up(M, 128)
    tm = (2 * 1024 * 1024) // max(c * win * itemsize, 1)
    tm = max(512, min(4096, (tm // 128) * 128))
    TM = max(128, min(tm, m128))
    M_pad = _round_up(M, TM)

    # --- Channel tiling: bound the pipelined fu block to ~4 MiB regardless of C
    # (keeps double-buffered inputs well inside v7x's 64 MiB VMEM).
    fu_full_bytes = c * win * TM * itemsize
    ct_budget = 4 * 1024 * 1024
    num_ct = max(1, -(-fu_full_bytes // ct_budget))
    CT = -(-c // num_ct)
    num_ct = -(-c // CT)
    c_pad = CT * num_ct

    # Zero-padded lanes have pos_hard == 0 -> valid == 0 -> zero contribution;
    # zero-padded channels contribute 0 to sq_pc/sq_nc.  Both paddings are exact.
    if M_pad != M:
        sm = jnp.pad(sm, ((0, 0), (0, M_pad - M)))
        fu = jnp.pad(fu, ((0, 0), (0, 0), (0, M_pad - M)))
    if c_pad != c:
        fu = jnp.pad(fu, ((0, c_pad - c), (0, 0), (0, 0)))

    # VMEM budget: double-buffered inputs + scratch + f32 intermediate headroom,
    # capped at 48 MiB so the same tiling is safe on v7x (64 MiB physical).
    est = (2 * (CT * win * TM * itemsize + win * TM * 4)
           + 2 * win * TM * 4
           + 8 * win * TM * 4
           + 4 * 2 * TM * 4)
    vmem_limit = int(min(48 * 1024 * 1024, max(32 * 1024 * 1024, 2 * est)))

    fu_spec_kwargs = {}
    if fu_buffers is not None:
        # TODO(synk): sweep fu_buffers=2 vs 3 if an xprof trace shows exposed DMA.
        fu_spec_kwargs["pipeline_mode"] = pl.Buffered(fu_buffers)
    fu_spec = pl.BlockSpec((CT, win, TM), lambda j, ci: (ci, 0, j), **fu_spec_kwargs)

    kernel_fn = functools.partial(
        _lwt_kernel, alpha=float(alpha), margin=float(margin),
        c_tile=CT, window=float(win))

    num_cols, valid_cols = pl.pallas_call(
        kernel_fn,
        out_shape=(jax.ShapeDtypeStruct((1, M_pad), jnp.float32),
                   jax.ShapeDtypeStruct((1, M_pad), jnp.float32)),
        grid=(M_pad // TM, num_ct),
        in_specs=[
            pl.BlockSpec((win, TM), lambda j, ci: (0, j)),
            fu_spec,
        ],
        out_specs=(pl.BlockSpec((1, TM), lambda j, ci: (0, j)),
                   pl.BlockSpec((1, TM), lambda j, ci: (0, j))),
        scratch_shapes=[pltpu.VMEM((win, TM), jnp.float32),
                        pltpu.VMEM((win, TM), jnp.float32)],
        compiler_params=pltpu.CompilerParams(
            # TODO(synk): on v7x (2 TCs) switch the lane axis to pltpu.CORE_PARALLEL
            # once verified on single-TC parts; plain "parallel" is kept for safety.
            dimension_semantics=("parallel", "arbitrary"),
            vmem_limit_bytes=vmem_limit),
    )(sm, fu)

    # Finish cheap lane reductions + per-batch normalization in JAX.
    # torch: loss[b,0,w] = sum_L(triple*valid) / (sum_L valid + eps); loss.mean()
    #      = mean_b( num_b / (win * (den_b + eps)) )  -- exact refactoring.
    num_b = num_cols[0, :M].reshape(b, L).sum(axis=1)
    den_b = valid_cols[0, :M].reshape(b, L).sum(axis=1)
    return jnp.mean(num_b / (win * (den_b + 1e-6)))


if __name__ == "__main__":
    # cfg: lwt_kernel=4, lwt_stride=4, lwt_alpha=0.5 (module has no learnable params)
    key = jax.random.PRNGKey(0)
    k1, k2 = jax.random.split(key)
    batch, channels = 2, 4
    map_in = jax.random.uniform(k1, (batch, 1, 8, 8), dtype=jnp.float32)   # coarse saliency map
    feat_in = jax.random.normal(k2, (batch, channels, 16, 16), dtype=jnp.float32)

    loss = local_window_triple_loss(
        map_in, feat_in, kernel=4, stride=4, alpha=0.5, margin=0.5
    )
    jax.block_until_ready(loss)
    print("KERNEL_OK")
</pallas_src>

<mosaic_0001>
module attributes {stable_mosaic.version = 11 : i64} {
  func.func @_lwt_kernel(%arg0: i32, %arg1: i32, %arg2: memref<16x128xf32, #tpu.memory_space<vmem>>, %arg3: memref<4x16x128xbf16, #tpu.memory_space<vmem>>, %arg4: memref<1x128xf32, #tpu.memory_space<vmem>>, %arg5: memref<1x128xf32, #tpu.memory_space<vmem>>, %arg6: memref<16x128xf32, #tpu.memory_space<vmem>>, %arg7: memref<16x128xf32, #tpu.memory_space<vmem>>) attributes {dimension_semantics = [#tpu.dimension_semantics<parallel>, #tpu.dimension_semantics<arbitrary>], iteration_bounds = array<i64: 1, 1>, scalar_prefetch = 0 : i64, scratch_operands = 2 : i64, tpu.core_type = #tpu.core_type<tc>, window_params = [{transform_indices = @transform_0, window_bounds = array<i64: 16, 128>}, {transform_indices = @transform_1, window_bounds = array<i64: 4, 16, 128>}, {transform_indices = @transform_2, window_bounds = array<i64: 1, 128>}, {transform_indices = @transform_3, window_bounds = array<i64: 1, 128>}]} {
    %c0_i32 = arith.constant 0 : i32
    %0 = arith.cmpi eq, %arg1, %c0_i32 : i32
    %1 = arith.extui %0 : i1 to i32
    %c0_i32_0 = arith.constant 0 : i32
    %2 = arith.cmpi ne, %1, %c0_i32_0 : i32
    scf.if %2 {
      %cst_32 = arith.constant 0.000000e+00 : f32
      %97 = vector.broadcast %cst_32 : f32 to vector<16x128xf32>
      %c0_33 = arith.constant 0 : index
      %c0_34 = arith.constant 0 : index
      %98 = vector.load %arg6[%c0_33, %c0_34] : memref<16x128xf32, #tpu.memory_space<vmem>>, vector<16x128xf32>
      tpu.vector_store %arg6[%c0_33, %c0_34], %97 {strides = array<i32>} : memref<16x128xf32, #tpu.memory_space<vmem>>, vector<16x128xf32>,
      %cst_35 = arith.constant 0.000000e+00 : f32
      %99 = vector.broadcast %cst_35 : f32 to vector<16x128xf32>
      %c0_36 = arith.constant 0 : index
      %c0_37 = arith.constant 0 : index
      %100 = vector.load %arg7[%c0_36, %c0_37] : memref<16x128xf32, #tpu.memory_space<vmem>>, vector<16x128xf32>
      tpu.vector_store %arg7[%c0_36, %c0_37], %99 {strides = array<i32>} : memref<16x128xf32, #tpu.memory_space<vmem>>, vector<16x128xf32>,
    } else {
    }
    %c0 = arith.constant 0 : index
    %c0_1 = arith.constant 0 : index
    %3 = vector.load %arg2[%c0, %c0_1] : memref<16x128xf32, #tpu.memory_space<vmem>>, vector<16x128xf32>
    %cst = arith.constant dense<0.000000e+00> : vector<128xf32>
    %4 = vector.multi_reduction <add>, %3, %cst [0] : vector<16x128xf32> to vector<128xf32>
    %5 = vector.shape_cast %4 : vector<128xf32> to vector<1x128xf32>
    %cst_2 = arith.constant 1.600000e+01 : f32
    %6 = vector.broadcast %cst_2 : f32 to vector<1x128xf32>
    %7 = arith.subf %6, %5 : vector<1x128xf32>
    %cst_3 = arith.constant 9.99999997E-7 : f32
    %8 = vector.broadcast %cst_3 : f32 to vector<1x128xf32>
    %9 = arith.addf %5, %8 : vector<1x128xf32>
    %10 = tpu.reciprocal %9 {approx = true} : vector<1x128xf32> -> vector<1x128xf32>
    %cst_4 = arith.constant 9.99999997E-7 : f32
    %11 = vector.broadcast %cst_4 : f32 to vector<1x128xf32>
    %12 = arith.addf %7, %11 : vector<1x128xf32>
    %13 = tpu.reciprocal %12 {approx = true} : vector<1x128xf32> -> vector<1x128xf32>
    %c0_5 = arith.constant 0 : index
    %c0_6 = arith.constant 0 : index
    %14 = vector.load %arg6[%c0_5, %c0_6] : memref<16x128xf32, #tpu.memory_space<vmem>>, vector<16x128xf32>
    %c0_7 = arith.constant 0 : index
    %c0_8 = arith.constant 0 : index
    %15 = vector.load %arg7[%c0_7, %c0_8] : memref<16x128xf32, #tpu.memory_space<vmem>>, vector<16x128xf32>
    %c0_9 = arith.constant 0 : index
    %c0_10 = arith.constant 0 : index
    %c0_11 = arith.constant 0 : index
    %16 = vector.load %arg3[%c0_9, %c0_10, %c0_11] : memref<4x16x128xbf16, #tpu.memory_space<vmem>>, vector<1x16x128xbf16>
    %17 = vector.shape_cast %16 : vector<1x16x128xbf16> to vector<16x128xbf16>
    %18 = arith.extf %17 : vector<16x128xbf16> to vector<16x128xf32>
    %19 = arith.mulf %3, %18 : vector<16x128xf32>
    %cst_12 = arith.constant dense<0.000000e+00> : vector<128xf32>
    %20 = vector.multi_reduction <add>, %19, %cst_12 [0] : vector<16x128xf32> to vector<128xf32>
    %21 = vector.shape_cast %20 : vector<128xf32> to vector<1x128xf32>
    %cst_13 = arith.constant dense<0.000000e+00> : vector<128xf32>
    %22 = vector.multi_reduction <add>, %18, %cst_13 [0] : vector<16x128xf32> to vector<128xf32>
    %23 = vector.shape_cast %22 : vector<128xf32> to vector<1x128xf32>
    %24 = arith.mulf %21, %10 : vector<1x128xf32>
    %25 = arith.subf %23, %21 : vector<1x128xf32>
    %26 = arith.mulf %25, %13 : vector<1x128xf32>
    %27 = vector.broadcast %24 : vector<1x128xf32> to vector<16x128xf32>
    %28 = arith.subf %27, %18 : vector<16x128xf32>
    %29 = arith.mulf %28, %28 : vector<16x128xf32>
    %30 = arith.addf %14, %29 : vector<16x128xf32>
    %31 = vector.broadcast %26 : vector<1x128xf32> to vector<16x128xf32>
    %32 = arith.subf %31, %18 : vector<16x128xf32>
    %33 = arith.mulf %32, %32 : vector<16x128xf32>
    %34 = arith.addf %15, %33 : vector<16x128xf32>
    %c1 = arith.constant 1 : index
    %c0_14 = arith.constant 0 : index
    %c0_15 = arith.constant 0 : index
    %35 = vector.load %arg3[%c1, %c0_14, %c0_15] : memref<4x16x128xbf16, #tpu.memory_space<vmem>>, vector<1x16x128xbf16>
    %36 = vector.shape_cast %35 : vector<1x16x128xbf16> to vector<16x128xbf16>
    %37 = arith.extf %36 : vector<16x128xbf16> to vector<16x128xf32>
    %38 = arith.mulf %3, %37 : vector<16x128xf32>
    %cst_16 = arith.constant dense<0.000000e+00> : vector<128xf32>
    %39 = vector.multi_reduction <add>, %38, %cst_16 [0] : vector<16x128xf32> to vector<128xf32>
    %40 = vector.shape_cast %39 : vector<128xf32> to vector<1x128xf32>
    %cst_17 = arith.constant dense<0.000000e+00> : vector<128xf32>
    %41 = vector.multi_reduction <add>, %37, %cst_17 [0] : vector<16x128xf32> to vector<128xf32>
    %42 = vector.shape_cast %41 : vector<128xf32> to vector<1x128xf32>
    %43 = arith.mulf %40, %10 : vector<1x128xf32>
    %44 = arith.subf %42, %40 : vector<1x128xf32>
    %45 = arith.mulf %44, %13 : vector<1x128xf32>
    %46 = vector.broadcast %43 : vector<1x128xf32> to vector<16x128xf32>
    %47 = arith.subf %46, %37 : vector<16x128xf32>
    %48 = arith.mulf %47, %47 : vector<16x128xf32>
    %49 = arith.addf %30, %48 : vector<16x128xf32>
    %50 = vector.broadcast %45 : vector<1x128xf32> to vector<16x128xf32>
    %51 = arith.subf %50, %37 : vector<16x128xf32>
    %52 = arith.mulf %51, %51 : vector<16x128xf32>
    %53 = arith.addf %34, %52 : vector<16x128xf32>
    %c2 = arith.constant 2 : index
    %c0_18 = arith.constant 0 : index
    %c0_19 = arith.constant 0 : index
    %54 = vector.load %arg3[%c2, %c0_18, %c0_19] : memref<4x16x128xbf16, #tpu.memory_space<vmem>>, vector<1x16x128xbf16>
    %55 = vector.shape_cast %54 : vector<1x16x128xbf16> to vector<16x128xbf16>
    %56 = arith.extf %55 : vector<16x128xbf16> to vector<16x128xf32>
    %57 = arith.mulf %3, %56 : vector<16x128xf32>
    %cst_20 = arith.constant dense<0.000000e+00> : vector<128xf32>
    %58 = vector.multi_reduction <add>, %57, %cst_20 [0] : vector<16x128xf32> to vector<128xf32>
    %59 = vector.shape_cast %58 : vector<128xf32> to vector<1x128xf32>
    %cst_21 = arith.constant dense<0.000000e+00> : vector<128xf32>
    %60 = vector.multi_reduction <add>, %56, %cst_21 [0] : vector<16x128xf32> to vector<128xf32>
    %61 = vector.shape_cast %60 : vector<128xf32> to vector<1x128xf32>
    %62 = arith.mulf %59, %10 : vector<1x128xf32>
    %63 = arith.subf %61, %59 : vector<1x128xf32>
    %64 = arith.mulf %63, %13 : vector<1x128xf32>
    %65 = vector.broadcast %62 : vector<1x128xf32> to vector<16x128xf32>
    %66 = arith.subf %65, %56 : vector<16x128xf32>
    %67 = arith.mulf %66, %66 : vector<16x128xf32>
    %68 = arith.addf %49, %67 : vector<16x128xf32>
    %69 = vector.broadcast %64 : vector<1x128xf32> to vector<16x128xf32>
    %70 = arith.subf %69, %56 : vector<16x128xf32>
    %71 = arith.mulf %70, %70 : vector<16x128xf32>
    %72 = arith.addf %53, %71 : vector<16x128xf32>
    %c3 = arith.constant 3 : index
    %c0_22 = arith.constant 0 : index
    %c0_23 = arith.constant 0 : index
    %73 = vector.load %arg3[%c3, %c0_22, %c0_23] : memref<4x16x128xbf16, #tpu.memory_space<vmem>>, vector<1x16x128xbf16>
    %74 = vector.shape_cast %73 : vector<1x16x128xbf16> to vector<16x128xbf16>
    %75 = arith.extf %74 : vector<16x128xbf16> to vector<16x128xf32>
    %76 = arith.mulf %3, %75 : vector<16x128xf32>
    %cst_24 = arith.constant dense<0.000000e+00> : vector<128xf32>
    %77 = vector.multi_reduction <add>, %76, %cst_24 [0] : vector<16x128xf32> to vector<128xf32>
    %78 = vector.shape_cast %77 : vector<128xf32> to vector<1x128xf32>
    %cst_25 = arith.constant dense<0.000000e+00> : vector<128xf32>
    %79 = vector.multi_reduction <add>, %75, %cst_25 [0] : vector<16x128xf32> to vector<128xf32>
    %80 = vector.shape_cast %79 : vector<128xf32> to vector<1x128xf32>
    %81 = arith.mulf %78, %10 : vector<1x128xf32>
    %82 = arith.subf %80, %78 : vector<1x128xf32>
    %83 = arith.mulf %82, %13 : vector<1x128xf32>
    %84 = vector.broadcast %81 : vector<1x128xf32> to vector<16x128xf32>
    %85 = arith.subf %84, %75 : vector<16x128xf32>
    %86 = arith.mulf %85, %85 : vector<16x128xf32>
    %87 = arith.addf %68, %86 : vector<16x128xf32>
    %88 = vector.broadcast %83 : vector<1x128xf32> to vector<16x128xf32>
    %89 = arith.subf %88, %75 : vector<16x128xf32>
    %90 = arith.mulf %89, %89 : vector<16x128xf32>
    %91 = arith.addf %72, %90 : vector<16x128xf32>
    %c0_26 = arith.constant 0 : index
    %c0_27 = arith.constant 0 : index
    %92 = vector.load %arg6[%c0_26, %c0_27] : memref<16x128xf32, #tpu.memory_space<vmem>>, vector<16x128xf32>
    tpu.vector_store %arg6[%c0_26, %c0_27], %87 {strides = array<i32>} : memref<16x128xf32, #tpu.memory_space<vmem>>, vector<16x128xf32>,
    %c0_28 = arith.constant 0 : index
    %c0_29 = arith.constant 0 : index
    %93 = vector.load %arg7[%c0_28, %c0_29] : memref<16x128xf32, #tpu.memory_space<vmem>>, vector<16x128xf32>
    tpu.vector_store %arg7[%c0_28, %c0_29], %91 {strides = array<i32>} : memref<16x128xf32, #tpu.memory_space<vmem>>, vector<16x128xf32>,
    %c0_i32_30 = arith.constant 0 : i32
    %94 = arith.cmpi eq, %arg1, %c0_i32_30 : i32
    %95 = arith.extui %94 : i1 to i32
    %c0_i32_31 = arith.constant 0 : i32
    %96 = arith.cmpi ne, %95, %c0_i32_31 : i32
    scf.if %96 {
      %cst_32 = arith.constant 5.000000e-01 : f32
      %97 = vector.broadcast %cst_32 : f32 to vector<16x128xf32>
      %98 = arith.cmpf ogt, %3, %97 : vector<16x128xf32>
      %99 = arith.extui %98 : vector<16x128xi1> to vector<16x128xi32>
      %100 = arith.sitofp %99 : vector<16x128xi32> to vector<16x128xf32>
      %cst_33 = arith.constant dense<0.000000e+00> : vector<128xf32>
      %101 = vector.multi_reduction <add>, %100, %cst_33 [0] : vector<16x128xf32> to vector<128xf32>
      %102 = vector.shape_cast %101 : vector<128xf32> to vector<1x128xf32>
      %cst_34 = arith.constant 5.000000e-01 : f32
      %103 = vector.broadcast %cst_34 : f32 to vector<1x128xf32>
      %104 = arith.cmpf ogt, %102, %103 : vector<1x128xf32>
      %cst_35 = arith.constant 1.600000e+01 : f32
      %105 = vector.broadcast %cst_35 : f32 to vector<1x128xf32>
      %106 = arith.subf %105, %102 : vector<1x128xf32>
      %cst_36 = arith.constant 5.000000e-01 : f32
      %107 = vector.broadcast %cst_36 : f32 to vector<1x128xf32>
      %108 = arith.cmpf ogt, %106, %107 : vector<1x128xf32>
      %109 = arith.andi %104, %108 : vector<1x128xi1>
      %110 = arith.extui %109 : vector<1x128xi1> to vector<1x128xi32>
      %111 = arith.sitofp %110 : vector<1x128xi32> to vector<1x128xf32>
      %cst_37 = arith.constant -5.000000e-01 : f32
      %112 = vector.broadcast %cst_37 : f32 to vector<16x128xf32>
      %113 = arith.mulf %112, %91 : vector<16x128xf32>
      %114 = math.exp %113 : vector<16x128xf32>
      %cst_38 = arith.constant -5.000000e-01 : f32
      %115 = vector.broadcast %cst_38 : f32 to vector<16x128xf32>
      %116 = arith.mulf %115, %87 : vector<16x128xf32>
      %117 = math.exp %116 : vector<16x128xf32>
      %118 = arith.subf %114, %117 : vector<16x128xf32>
      %cst_39 = arith.constant 0.000000e+00 : f32
      %119 = vector.broadcast %cst_39 : f32 to vector<16x128xf32>
      %120 = arith.subf %119, %118 : vector<16x128xf32>
      %121 = arith.select %98, %118, %120 : vector<16x128xi1>, vector<16x128xf32>
      %cst_40 = arith.constant 5.000000e-01 : f32
      %122 = vector.broadcast %cst_40 : f32 to vector<16x128xf32>
      %123 = arith.addf %121, %122 : vector<16x128xf32>
      %cst_41 = arith.constant 0.000000e+00 : f32
      %124 = vector.broadcast %cst_41 : f32 to vector<16x128xf32>
      %125 = arith.maximumf %123, %124 : vector<16x128xf32>
      %cst_42 = arith.constant dense<0.000000e+00> : vector<128xf32>
      %126 = vector.multi_reduction <add>, %125, %cst_42 [0] : vector<16x128xf32> to vector<128xf32>
      %127 = vector.shape_cast %126 : vector<128xf32> to vector<1x128xf32>
      %128 = arith.mulf %111, %127 : vector<1x128xf32>
      %c0_43 = arith.constant 0 : index
      %c0_44 = arith.constant 0 : index
      %129 = vector.load %arg4[%c0_43, %c0_44] : memref<1x128xf32, #tpu.memory_space<vmem>>, vector<1x128xf32>
      tpu.vector_store %arg4[%c0_43, %c0_44], %128 {strides = array<i32>} : memref<1x128xf32, #tpu.memory_space<vmem>>, vector<1x128xf32>,
      %c0_45 = arith.constant 0 : index
      %c0_46 = arith.constant 0 : index
      %130 = vector.load %arg5[%c0_45, %c0_46] : memref<1x128xf32, #tpu.memory_space<vmem>>, vector<1x128xf32>
      tpu.vector_store %arg5[%c0_45, %c0_46], %111 {strides = array<i32>} : memref<1x128xf32, #tpu.memory_space<vmem>>, vector<1x128xf32>,
    } else {
    }
    return
  }
  func.func @transform_0(%arg0: i32, %arg1: i32) -> (i32, i32) {
    %c0_i32 = arith.constant 0 : i32
    %c0_i32_0 = arith.constant 0 : i32
    return %c0_i32, %arg0 : i32, i32
  }
  func.func @transform_1(%arg0: i32, %arg1: i32) -> (i32, i32, i32) {
    %c0_i32 = arith.constant 0 : i32
    %c0_i32_0 = arith.constant 0 : i32
    return %arg1, %c0_i32, %arg0 : i32, i32, i32
  }
  func.func @transform_2(%arg0: i32, %arg1: i32) -> (i32, i32) {
    %c0_i32 = arith.constant 0 : i32
    %c0_i32_0 = arith.constant 0 : i32
    return %c0_i32, %arg0 : i32, i32
  }
  func.func @transform_3(%arg0: i32, %arg1: i32) -> (i32, i32) {
    %c0_i32 = arith.constant 0 : i32
    %c0_i32_0 = arith.constant 0 : i32
    return %c0_i32, %arg0 : i32, i32
  }
}

</mosaic_0001>

<bundles_post_ra>
// kernel: tpu_custom_call.1
= control target key start
LH: loop header
LB: loop body
LE: loop exit
PB: predicated region body
PF: predicated region fallthrough
CT: control target
= control target key end

     0   :  { %9 = vsyncpa [#allocation5], 0  ;;  %s568_s0 = inlined_call_operand.hbm [shape: f32[16,128], index: 0, kind: input, shape index: {}]   ;;  %s569_s1 = inlined_call_operand.hbm [shape: bf16[4,16,128], index: 1, kind: input, shape index: {}]   ;;  %s570_s2 = inlined_call_operand.hbm [shape: f32[1,128], index: 2, kind: output, shape index: {0}]   ;;  %s571_s3 = inlined_call_operand.hbm [shape: f32[1,128], index: 3, kind: output, shape index: {1}]  }
   0x1   :  { %10 = vsyncpa [#allocation8], 0 }
   0x2   :  { %11 = vsyncpa [#allocation6], 0 }
   0x3   :  { %12 = vsyncpa [#allocation11], 0  ;;  %s17_s14 = sshll.u32 %s568_s0, 4  ;;  %s452_s15 = smov [#allocation4]   ;;  %s18_s14 = int_to_ptr.hbm [resolvable:$true] %s17_s14 }
   0x4   :  { %s19_s16 = sshll.u32 %s452_s15, 4  ;;  %s30_s19 = sshll.u32 %s569_s1, 4  ;;  %s20_s16 = int_to_ptr.vmem [resolvable:$true] %s19_s16  ;;  %s31_s19 = int_to_ptr.hbm [resolvable:$true] %s30_s19 }
   0x5   :  { %s453_s20 = smov 128   ;;  %s454_s21 = smov 8  }
   0x6   :  { %25 = dma.hbm_to_vmem [thread:$0]  %s18_s14, 256, %s20_s16, [#allocation5], %s453_s20, %s453_s20, %s454_s21  }
   0x7   :  { %s455_s22 = smov [#allocation7]   ;;  %s456_s24 = smov 64  }
   0x8   :  { %s32_s23 = sshll.u32 %s455_s22, 4  ;;  %s457_s25 = smov 4   ;;  %s33_s23 = int_to_ptr.vmem [resolvable:$true] %s32_s23 }
   0x9   :  { %38 = dma.hbm_to_vmem [thread:$0]  %s31_s19, 512, %s33_s23, [#allocation8], %s456_s24, %s456_s24, %s457_s25  }
   0xa   :  { %444 = dma.done.wait [#allocation5], 256  }
   0xb   :  { %445 = vsyncadd [#allocation5], 4294967040 }
   0xc   :  { %446 = dma.done.wait [#allocation8], 512  }
   0xd   :  { %447 = vsyncadd [#allocation8], 4294966784  ;;  %v487_v0 = vld [vmem:[#allocation4] sm:$0xff]  ;;  %v489_v1 = vld [vmem:[#allocation4 + $0x8] sm:$0xff]  ;;  %s459_s0 = smov [#allocation10]   ;;  %s292_s28 = sshll.u32 %s571_s3, 4  ;;  %s293_s28 = int_to_ptr.hbm [resolvable:$true] %s292_s28 }
   0xe   :  { %v312_v2 = vld [vmem:[#allocation7] sm:$0xff]   ;;  %v57_v3 = vadd.f32 %v489_v1, %v487_v0  ;;  %v316_v6 = vld [vmem:[#allocation7 + $0x8] sm:$0xff]   ;;  %v320_v7 = vld [vmem:[#allocation7 + $0x10] sm:$0xff]   ;;  %vm223_vm0 = vcmp.gt.f32.partialorder %v487_v0, 0.5  ;;  %vm224_vm1 = vcmp.gt.f32.partialorder %v489_v1, 0.5  ;;  %s290_s1 = sshll.u32 %s459_s0, 4  ;;  %s291_s1 = int_to_ptr.vmem [resolvable:$true] %s290_s1 }
   0xf   :  { %v493_v4 = vunpack.c.l.bf16 %v312_v2  ;;  %v495_v5 = vunpack.c.h.bf16 %v312_v2  ;;  %v497_v8 = vunpack.c.l.bf16 %v316_v6  ;;  %v499_v9 = vunpack.c.h.bf16 %v316_v6  ;;  %v324_v16 = vld [vmem:[#allocation7 + $0x18] sm:$0xff]   ;;  %s460_s3 = smov [#allocation9]   ;;  %s281_s5 = sshll.u32 %s570_s2, 4  ;;  %s282_s5 = int_to_ptr.hbm [resolvable:$true] %s281_s5 }
  0x10   :  { %v501_v10 = vunpack.c.l.bf16 %v320_v7  ;;  %v503_v11 = vunpack.c.h.bf16 %v320_v7  ;;  %v58_v12 = vrot.slane %v57_v3, 4  ;;  %v523_v28 = vunpack.c.l.bf16 %v324_v16  ;;  %s279_s29 = sshll.u32 %s460_s3, 4  ;;  %s280_s29 = int_to_ptr.vmem [resolvable:$true] %s279_s29 }
  0x11   :  { %v77_v13 = vmul.f32 %v493_v4, %v487_v0  ;;  %v78_v14 = vmul.f32 %v495_v5, %v489_v1  ;;  %v86_v15 = vadd.f32 %v495_v5, %v493_v4  ;;  %v113_v17 = vmul.f32 %v497_v8, %v487_v0 }
  0x12   :  { %v114_v18 = vmul.f32 %v499_v9, %v489_v1  ;;  %v122_v19 = vadd.f32 %v499_v9, %v497_v8  ;;  %v149_v20 = vmul.f32 %v501_v10, %v487_v0  ;;  %v59_v21 = vadd.f32 %v58_v12, %v57_v3 }
  0x13   :  { %v79_v22 = vadd.f32 %v78_v14, %v77_v13  ;;  %v87_v23 = vrot.slane %v86_v15, 4  ;;  %v150_v24 = vmul.f32 %v503_v11, %v489_v1  ;;  %v158_v27 = vadd.f32 %v503_v11, %v501_v10 }
  0x14   :  { %v115_v25 = vadd.f32 %v114_v18, %v113_v17  ;;  %v123_v26 = vrot.slane %v122_v19, 4  ;;  %v60_v29 = vrot.slane %v59_v21, 2  ;;  %v525_v36 = vunpack.c.h.bf16 %v324_v16 }
  0x15   :  { %v80_v30 = vrot.slane %v79_v22, 4  ;;  %v88_v31 = vadd.f32 %v87_v23, %v86_v15  ;;  %v151_v32 = vadd.f32 %v150_v24, %v149_v20  ;;  %v159_v35 = vrot.slane %v158_v27, 4 }
  0x16   :  { %v116_v33 = vrot.slane %v115_v25, 4  ;;  %v124_v34 = vadd.f32 %v123_v26, %v122_v19  ;;  %v61_v37 = vadd.f32 %v60_v29, %v59_v21  ;;  %v185_v44 = vmul.f32 %v523_v28, %v487_v0 }
  0x17   :  { %v81_v38 = vadd.f32 %v80_v30, %v79_v22  ;;  %v89_v39 = vrot.slane %v88_v31, 2  ;;  %v152_v40 = vrot.slane %v151_v32, 4  ;;  %v160_v43 = vadd.f32 %v159_v35, %v158_v27 }
  0x18   :  { %v117_v41 = vadd.f32 %v116_v33, %v115_v25  ;;  %v125_v42 = vrot.slane %v124_v34, 2  ;;  %v62_v45 = vrot.slane %v61_v37, 1  ;;  %v186_v52 = vmul.f32 %v525_v36, %v489_v1 }
  0x19   :  { %v82_v46 = vrot.slane %v81_v38, 2  ;;  %v90_v47 = vadd.f32 %v89_v39, %v88_v31  ;;  %v153_v48 = vadd.f32 %v152_v40, %v151_v32  ;;  %v161_v51 = vrot.slane %v160_v43, 2 }
  0x1a   :  { %v118_v49 = vrot.slane %v117_v41, 2  ;;  %v126_v50 = vadd.f32 %v125_v42, %v124_v34  ;;  %v63_v53 = vadd.f32 %v62_v45, %v61_v37  ;;  %v187_v60 = vadd.f32 %v186_v52, %v185_v44 }
  0x1b   :  { %v83_v54 = vadd.f32 %v82_v46, %v81_v38  ;;  %v91_v55 = vrot.slane %v90_v47, 1  ;;  %v154_v56 = vrot.slane %v153_v48, 2  ;;  %v162_v59 = vadd.f32 %v161_v51, %v160_v43 }
  0x1c   :  { %v119_v57 = vadd.f32 %v118_v49, %v117_v41  ;;  %v127_v58 = vrot.slane %v126_v50, 1  ;;  %v64_v61 = vsub.f32 16.0, %v63_v53  ;;  %v65_v62 = vadd.f32 1e-06, %v63_v53 }
  0x1d   :  { %v84_v63 = vrot.slane %v83_v54, 1  ;;  %v92_v2 = vadd.f32 %v91_v55, %v90_v47  ;;  %v155_v6 = vadd.f32 %v154_v56, %v153_v48  ;;  %v163_v7 = vrot.slane %v162_v59, 1 }
  0x1e   :  { %v120_v3 = vrot.slane %v119_v57, 1  ;;  %336 = vrcp.f32 %v65_v62  ;;  %v67_v12 = vadd.f32 1e-06, %v64_v61  ;;  %v188_v14 = vrot.slane %v187_v60, 4 }
  0x1f   :  { %v85_v13 = vadd.f32 %v84_v63, %v83_v54  ;;  %v128_v16 = vadd.f32 %v127_v58, %v126_v50  ;;  %v156_v17 = vrot.slane %v155_v6, 1  ;;  %v194_v18 = vadd.f32 %v525_v36, %v523_v28 }
  0x20   :  { %v121_v15 = vadd.f32 %v120_v3, %v119_v57  ;;  %338 = vrcp.f32 %v67_v12  ;;  %v189_v19 = vadd.f32 %v188_v14, %v187_v60  ;;  %v164_v20 = vadd.f32 %v163_v7, %v162_v59 }
  0x21   :  { %v195_v21 = vrot.slane %v194_v18, 4  ;;  %v94_v22 = vsub.f32 %v92_v2, %v85_v13  ;;  %v157_v23 = vadd.f32 %v156_v17, %v155_v6  ;;  %v458_v27 = vmov 0.0  }
  0x22   :  { %v190_v24 = vrot.slane %v189_v19, 2  ;;  %v130_v25 = vsub.f32 %v128_v16, %v121_v15  ;;  %v308_v29 = vsel %vm223_vm0, 1.0, %v458_v27  ;;  %v309_v30 = vsel %vm224_vm1, 1.0, %v458_v27 }
  0x23   :  { %v196_v26 = vadd.f32 %v195_v21, %v194_v18  ;;  %v166_v38 = vsub.f32 %v164_v20, %v157_v23  ;;  %v229_v40 = vadd.f32 %v309_v30, %v308_v29 }
  0x24   :  { %v337_v31 = vpop.eup %336  ;;  %v191_v32 = vadd.f32 %v190_v24, %v189_v19 }
  0x25   :  { %v93_v33 = vmul.f32 %v337_v31, %v85_v13  ;;  %v129_v34 = vmul.f32 %v337_v31, %v121_v15  ;;  %v165_v35 = vmul.f32 %v337_v31, %v157_v23  ;;  %v197_v39 = vrot.slane %v196_v26, 2 }
  0x26   :  { %v339_v37 = vpop.eup %338  ;;  %v192_v48 = vrot.slane %v191_v32, 1  ;;  %v230_v61 = vrot.slane %v229_v40, 4 }
  0x27   :  { %v95_v41 = vmul.f32 %v339_v37, %v94_v22  ;;  %v96_v42 = vsub.f32 %v93_v33, %v493_v4  ;;  %v97_v43 = vsub.f32 %v93_v33, %v495_v5  ;;  %v131_v44 = vmul.f32 %v339_v37, %v130_v25 }
  0x28   :  { %v132_v45 = vsub.f32 %v129_v34, %v497_v8  ;;  %v133_v46 = vsub.f32 %v129_v34, %v499_v9  ;;  %v168_v47 = vsub.f32 %v165_v35, %v501_v10  ;;  %v167_v57 = vmul.f32 %v339_v37, %v166_v38 }
  0x29   :  { %v98_v49 = vmul.f32 %v96_v42, %v96_v42  ;;  %v99_v50 = vmul.f32 %v97_v43, %v97_v43  ;;  %v102_v51 = vsub.f32 %v95_v41, %v493_v4  ;;  %v103_v52 = vsub.f32 %v95_v41, %v495_v5 }
  0x2a   :  { %v134_v53 = vmul.f32 %v132_v45, %v132_v45  ;;  %v135_v54 = vmul.f32 %v133_v46, %v133_v46  ;;  %v138_v55 = vsub.f32 %v131_v44, %v497_v8  ;;  %v139_v56 = vsub.f32 %v131_v44, %v499_v9 }
  0x2b   :  { %v169_v58 = vsub.f32 %v165_v35, %v503_v11  ;;  %v104_v59 = vmul.f32 %v102_v51, %v102_v51  ;;  %v170_v60 = vmul.f32 %v168_v47, %v168_v47  ;;  %v193_v3 = vadd.f32 %v192_v48, %v191_v32 }
  0x2c   :  { %v136_v62 = vadd.f32 %v134_v53, %v98_v49  ;;  %v137_v63 = vadd.f32 %v135_v54, %v99_v50  ;;  %v105_v6 = vmul.f32 %v103_v52, %v103_v52  ;;  %v140_v4 = vmul.f32 %v138_v55, %v138_v55 }
  0x2d   :  { %v171_v2 = vmul.f32 %v169_v58, %v169_v58  ;;  %v141_v7 = vmul.f32 %v139_v56, %v139_v56  ;;  %v198_v5 = vadd.f32 %v197_v39, %v196_v26  ;;  %v174_v12 = vsub.f32 %v167_v57, %v501_v10 }
  0x2e   :  { %v175_v8 = vsub.f32 %v167_v57, %v503_v11  ;;  %v201_v13 = vmul.f32 %v337_v31, %v193_v3  ;;  %v231_v14 = vadd.f32 %v230_v61, %v229_v40  ;;  %v172_v15 = vadd.f32 %v170_v60, %v136_v62 }
  0x2f   :  { %v199_v9 = vrot.slane %v198_v5, 1  ;;  %v173_v16 = vadd.f32 %v171_v2, %v137_v63  ;;  %v142_v19 = vadd.f32 %v140_v4, %v104_v59  ;;  %v143_v20 = vadd.f32 %v141_v7, %v105_v6 }
  0x30   :  { %v204_v17 = vsub.f32 %v201_v13, %v523_v28  ;;  %v205_v18 = vsub.f32 %v201_v13, %v525_v36  ;;  %v232_v22 = vrot.slane %v231_v14, 2  ;;  %v176_v23 = vmul.f32 %v174_v12, %v174_v12 }
  0x31   :  { %v200_v21 = vadd.f32 %v199_v9, %v198_v5  ;;  %v177_v24 = vmul.f32 %v175_v8, %v175_v8 }
  0x32   :  { %v206_v25 = vmul.f32 %v204_v17, %v204_v17  ;;  %v207_v26 = vmul.f32 %v205_v18, %v205_v18  ;;  %v233_v29 = vadd.f32 %v232_v22, %v231_v14  ;;  %v178_v33 = vadd.f32 %v176_v23, %v142_v19 }
  0x33   :  { %v202_v10 = vsub.f32 %v200_v21, %v193_v3  ;;  %v179_v34 = vadd.f32 %v177_v24, %v143_v20 }
  0x34   :  { %v208_v11 = vadd.f32 %v206_v25, %v172_v15  ;;  %v209_v30 = vadd.f32 %v207_v26, %v173_v16  ;;  %v234_v32 = vrot.slane %v233_v29, 1 }
  0x35   :  { %v203_v31 = vmul.f32 %v339_v37, %v202_v10 }
  0x36   :  { %v235_v39 = vadd.f32 %v234_v32, %v233_v29  ;;  %v248_v40 = vmul.f32 -0.5, %v208_v11  ;;  %v249_v41 = vmul.f32 -0.5, %v209_v30 }
  0x37   :  { %v210_v35 = vsub.f32 %v203_v31, %v523_v28  ;;  %v211_v38 = vsub.f32 %v203_v31, %v525_v36 }
  0x38   :  { %vm236_vm2 = vcmp.gt.f32.partialorder %v235_v39, 0.5  ;;  %v237_v44 = vsub.f32 16.0, %v235_v39  ;;  %v250_v46 = vmul.f32 1.442695, %v248_v40  ;;  %v252_v28 = vmul.f32 1.442695, %v249_v41 }
  0x39   :  { %v212_v42 = vmul.f32 %v210_v35, %v210_v35  ;;  %v213_v43 = vmul.f32 %v211_v38, %v211_v38 }
  0x3a   :  { %vm238_vm3 = vcmp.gt.f32.partialorder %v237_v44, 0.5  ;;  %340 = vpow2.f32 %v250_v46 }
  0x3b   :  { %v214_v37 = vadd.f32 %v212_v42, %v178_v33  ;;  %v215_v45 = vadd.f32 %v213_v43, %v179_v34  ;;  %vm239_vm4 = vmand %vm236_vm2, %vm238_vm3  ;;  %342 = vpow2.f32 %v252_v28 }
  0x3c   :  { %v310_v36 = vsel %vm239_vm4, 1.0, %v458_v27 }
  0x3d   :  { %v242_v47 = vmul.f32 -0.5, %v214_v37  ;;  %v243_v48 = vmul.f32 -0.5, %v215_v45  ;;  %273 = vst [vmem:[#allocation10] sm:$0x1] %v310_v36 }
  0x3e   :  { %295 = dma.vmem_to_hbm [thread:$0]  %s291_s1, 16, %s293_s28, [#allocation11]  }
  0x3f   :  { %v244_v49 = vmul.f32 1.442695, %v242_v47  ;;  %v246_v50 = vmul.f32 1.442695, %v243_v48 }
  0x40   :  { %v341_v51 = vpop.eup %340 }
  0x41   :  { %344 = vpow2.f32 %v244_v49  ;;  %v343_v52 = vpop.eup %342 }
  0x42   :  { %346 = vpow2.f32 %v246_v50 }
  0x47   :  { %v345_v53 = vpop.eup %344 }
  0x48   :  { %v347_v54 = vpop.eup %346  ;;  %v254_v55 = vsub.f32 %v345_v53, %v341_v51 }
  0x49   :  { %v255_v56 = vsub.f32 %v347_v54, %v343_v52 }
  0x4a   :  { %v256_v57 = vsub.f32 0.0, %v254_v55 }
  0x4b   :  { %v257_v58 = vsub.f32 0.0, %v255_v56 }
  0x4c   :  { %v258_v27 = vsel %vm223_vm0, %v254_v55, %v256_v57 }
  0x4d   :  { %v259_v59 = vsel %vm224_vm1, %v255_v56, %v257_v58  ;;  %v260_v60 = vadd.f32 0.5, %v258_v27 }
  0x4e   :  { %v261_v61 = vadd.f32 0.5, %v259_v59 }
  0x4f   :  { %v262_v62 = vmax.f32 %v260_v60, 0.0 }
  0x50   :  { %v263_v63 = vmax.f32 %v261_v61, 0.0 }
  0x52   :  { %v264_v2 = vadd.f32 %v263_v63, %v262_v62 }
  0x54   :  { %v265_v3 = vrot.slane %v264_v2, 4 }
  0x56   :  { %v266_v6 = vadd.f32 %v265_v3, %v264_v2 }
  0x58   :  { %v267_v4 = vrot.slane %v266_v6, 2 }
  0x5a   :  { %v268_v7 = vadd.f32 %v267_v4, %v266_v6 }
  0x5c   :  { %v269_v5 = vrot.slane %v268_v7, 1 }
  0x5e   :  { %v270_v0 = vadd.f32 %v269_v5, %v268_v7 }
  0x60   :  { %v271_v12 = vmul.f32 %v310_v36, %v270_v0 }
  0x62   :  { %272 = vst [vmem:[#allocation9] sm:$0x1] %v271_v12 }
  0x63   :  { %284 = dma.vmem_to_hbm [thread:$0]  %s280_s29, 16, %s282_s5, [#allocation6]  }
  0x64   :  { %448 = dma.done.wait [#allocation6], 16  }
  0x65   :  { %449 = vsyncadd [#allocation6], 4294967280 }
  0x66   :  { %450 = dma.done.wait [#allocation11], 16  }
  0x67   :  { %451 = vsyncadd [#allocation11], 4294967280 }
  0x68   :  { %304 = vsyncpa [#allocation5], 1 }
  0x69   :  { %305 = vsyncpa [#allocation8], 1 }
  0x6a   :  { %306 = vsyncpa [#allocation6], 1 }
  0x6b   :  { %307 = vsyncpa [#allocation11], 1 }

</bundles_post_ra>
